<compile_context>
chip_gen: v6e
topology: v6e:2x2x1
jax: 0.10.0
libtpu: 0.0.40
codegen_flags: <defaults>
</compile_context>

<pallas_src>
import functools

import jax
import jax.numpy as jnp
from jax.experimental import pallas as pl
from jax.experimental.pallas import tpu as pltpu


def _triplet_kernel(xi_ref, xj_ref, sqi_ref, sqj_ref, ti_ref, tj_ref,
                    out_ref, ap2_ref, an2_ref, *, margin, n):
    i = pl.program_id(0)
    j = pl.program_id(1)
    tm = ap2_ref.shape[0]
    tn = xj_ref.shape[0]

    @pl.when(j == 0)
    def _init():
        ap2_ref[...] = jnp.full(ap2_ref.shape, -1e30, ap2_ref.dtype)
        an2_ref[...] = jnp.full(an2_ref.shape, 1e30, an2_ref.dtype)

    # Gram tile on the MXU: contraction over the (padded) feature dim without
    # an explicit transpose; operands may be bf16, accumulation is f32.
    gram = jax.lax.dot_general(
        xi_ref[...], xj_ref[...],
        dimension_numbers=(((1,), (1,)), ((), ())),
        preferred_element_type=jnp.float32)                        # (TM, TN)

    # Squared pairwise distances: (TM,1) row term + (1,TN) col term broadcast.
    dist2 = sqi_ref[...] + sqj_ref[...] - 2.0 * gram               # (TM, TN)

    # Same-identity mask and column validity (exclude zero-padded columns).
    same = ti_ref[...] == tj_ref[...]                              # (TM, TN)
    col = j * tn + jax.lax.broadcasted_iota(jnp.int32, (tm, tn), 1)
    valid = col < n
    pos = jnp.logical_and(same, valid)
    neg = jnp.logical_and(jnp.logical_not(same), valid)

    # Running batch-hard mining on squared distances. sqrt(max(., 1e-12)) is
    # monotone, so the argmax/argmin pairs are identical to mining on dist.
    ap2_ref[...] = jnp.maximum(
        ap2_ref[...],
        jnp.max(jnp.where(pos, dist2, -1e30), axis=1, keepdims=True))
    an2_ref[...] = jnp.minimum(
        an2_ref[...],
        jnp.min(jnp.where(neg, dist2, 1e30), axis=1, keepdims=True))

    @pl.when(j == pl.num_programs(1) - 1)
    def _finalize():
        dist_ap = jnp.sqrt(jnp.maximum(ap2_ref[...], 1e-12))       # (TM, 1)
        dist_an = jnp.sqrt(jnp.maximum(an2_ref[...], 1e-12))       # (TM, 1)
        hinge = jnp.maximum(dist_ap - dist_an + jnp.float32(margin), 0.0)
        # Zero out padded anchor rows before the per-block partial sum.
        row = i * tm + jax.lax.broadcasted_iota(jnp.int32, (tm, 1), 0)
        hinge = jnp.where(row < n, hinge, 0.0)
        # Lane-dense partial-sum write; mean reduction finishes in the wrapper.
        out_ref[...] = jnp.broadcast_to(jnp.sum(hinge), out_ref.shape)


def _round_up(x, m):
    return ((x + m - 1) // m) * m


def triplet_loss(inputs, targets, margin=0.3, *, tile=256,
                 matmul_dtype=jnp.bfloat16):
    """inputs: (n, d) float32 features, targets: (n,) int labels -> scalar loss."""
    n, d = inputs.shape
    x = inputs.astype(jnp.float32)

    # Pad feature dim to a lane multiple (MXU-friendly K) and rows to a tile
    # multiple so every block is (8,128)-aligned.
    d_pad = _round_up(max(d, 128), 128)
    tile = min(tile, _round_up(n, 128))
    n_pad = _round_up(n, tile)

    x_pad = jnp.zeros((n_pad, d_pad), jnp.float32).at[:n, :d].set(x)
    # Squared norms computed once in f32; provide both sublane-major (row side)
    # and lane-major (column side) copies so the kernel never transposes.
    sq_row = jnp.sum(x_pad * x_pad, axis=1, keepdims=True)          # (n_pad, 1)
    sq_col = sq_row.reshape(1, n_pad)                               # (1, n_pad)
    t_pad = jnp.full((n_pad,), -1, jnp.int32).at[:n].set(targets.astype(jnp.int32))
    t_row = t_pad.reshape(n_pad, 1)
    t_col = t_pad.reshape(1, n_pad)

    x_mm = x_pad.astype(matmul_dtype)   # MXU operands only; elementwise stays f32

    n_blk = n_pad // tile
    grid = (n_blk, n_blk)

    partial = pl.pallas_call(
        functools.partial(_triplet_kernel, margin=float(margin), n=n),
        out_shape=jax.ShapeDtypeStruct((n_blk, 8, 128), jnp.float32),
        grid=grid,
        in_specs=[
            pl.BlockSpec((tile, d_pad), lambda i, j: (i, 0)),   # anchor rows
            pl.BlockSpec((tile, d_pad), lambda i, j: (j, 0)),   # candidate rows
            pl.BlockSpec((tile, 1), lambda i, j: (i, 0)),       # ||x_i||^2 (sublane-major)
            pl.BlockSpec((1, tile), lambda i, j: (0, j)),       # ||x_j||^2 (lane-major)
            pl.BlockSpec((tile, 1), lambda i, j: (i, 0)),       # labels rows
            pl.BlockSpec((1, tile), lambda i, j: (0, j)),       # labels cols
        ],
        out_specs=pl.BlockSpec((1, 8, 128), lambda i, j: (i, 0, 0)),
        scratch_shapes=[
            pltpu.VMEM((tile, 1), jnp.float32),   # running max dist^2 to positives
            pltpu.VMEM((tile, 1), jnp.float32),   # running min dist^2 to negatives
        ],
        compiler_params=pltpu.CompilerParams(
            dimension_semantics=("parallel", "arbitrary"),
            vmem_limit_bytes=32 * 1024 * 1024,
        ),
    )(x_mm, x_mm, sq_row, sq_col, t_row, t_col)

    # MarginRankingLoss(y=1, reduction='mean') over the n real anchors.
    return jnp.sum(partial[:, 0, 0]) / jnp.float32(n)


def _triplet_loss_ref(inputs, targets, margin=0.3):
    """Pure-JAX reference mirroring the PyTorch forward, for verification."""
    sq = jnp.sum(inputs * inputs, axis=1, keepdims=True)
    gram = jnp.dot(inputs, inputs.T, precision=jax.lax.Precision.HIGHEST)
    dist = jnp.sqrt(jnp.maximum(sq + sq.T - 2.0 * gram, 1e-12))
    mask = targets[:, None] == targets[None, :]
    dist_ap = jnp.max(jnp.where(mask, dist, -jnp.inf), axis=1)
    dist_an = jnp.min(jnp.where(mask, jnp.inf, dist), axis=1)
    return jnp.mean(jnp.maximum(dist_ap - dist_an + margin, 0.0))


if __name__ == "__main__":
    key = jax.random.PRNGKey(0)
    n, d = 8, 32  # batch_size, feat_dim
    inputs = jax.random.normal(key, (n, d), dtype=jnp.float32)
    # Labels chosen so every anchor has >=1 positive and >=1 negative (same
    # assumption as the original PyTorch hard-mining loop).
    targets = jnp.array([0, 0, 1, 1, 2, 2, 3, 3], dtype=jnp.int32)

    ref = _triplet_loss_ref(inputs, targets, margin=0.3)

    # f32 MXU path: must match the PyTorch-mirror reference tightly.
    loss_f32 = triplet_loss(inputs, targets, margin=0.3, matmul_dtype=jnp.float32)
    jax.block_until_ready(loss_f32)
    assert jnp.allclose(loss_f32, ref, rtol=1e-3, atol=1e-3), (loss_f32, ref)

    # bf16 MXU operands (default; recommended for v6e/v7x). Only the Gram term
    # carries bf16 rounding; accumulation and all elementwise math stay f32.
    loss_bf16 = triplet_loss(inputs, targets, margin=0.3)
    jax.block_until_ready(loss_bf16)
    assert jnp.allclose(loss_bf16, ref, rtol=1e-1, atol=1e-1), (loss_bf16, ref)

    print("KERNEL_OK")
</pallas_src>

<mosaic_0001>
module attributes {stable_mosaic.version = 11 : i64} {
  func.func @_triplet_kernel(%arg0: i32, %arg1: i32, %arg2: memref<128x128xf32, #tpu.memory_space<vmem>>, %arg3: memref<128x128xf32, #tpu.memory_space<vmem>>, %arg4: memref<128x1xf32, #tpu.memory_space<vmem>>, %arg5: memref<1x128xf32, #tpu.memory_space<vmem>>, %arg6: memref<128x1xi32, #tpu.memory_space<vmem>>, %arg7: memref<1x128xi32, #tpu.memory_space<vmem>>, %arg8: memref<1x8x128xf32, #tpu.memory_space<vmem>>, %arg9: memref<128x1xf32, #tpu.memory_space<vmem>>, %arg10: memref<128x1xf32, #tpu.memory_space<vmem>>) attributes {dimension_semantics = [#tpu.dimension_semantics<parallel>, #tpu.dimension_semantics<arbitrary>], iteration_bounds = array<i64: 1, 1>, scalar_prefetch = 0 : i64, scratch_operands = 2 : i64, tpu.core_type = #tpu.core_type<tc>, window_params = [{transform_indices = @transform_0, window_bounds = array<i64: 128, 128>}, {transform_indices = @transform_1, window_bounds = array<i64: 128, 128>}, {transform_indices = @transform_2, window_bounds = array<i64: 128, 1>}, {transform_indices = @transform_3, window_bounds = array<i64: 1, 128>}, {transform_indices = @transform_4, window_bounds = array<i64: 128, 1>}, {transform_indices = @transform_5, window_bounds = array<i64: 1, 128>}, {transform_indices = @transform_6, window_bounds = array<i64: 1, 8, 128>}]} {
    %c0_i32 = arith.constant 0 : i32
    %0 = arith.cmpi eq, %arg1, %c0_i32 : i32
    %1 = arith.extui %0 : i1 to i32
    %c0_i32_0 = arith.constant 0 : i32
    %2 = arith.cmpi ne, %1, %c0_i32_0 : i32
    scf.if %2 {
      %cst_28 = arith.constant -1.000000e+30 : f32
      %45 = vector.broadcast %cst_28 : f32 to vector<128x1xf32>
      %c0_29 = arith.constant 0 : index
      %c0_30 = arith.constant 0 : index
      %46 = vector.load %arg9[%c0_29, %c0_30] : memref<128x1xf32, #tpu.memory_space<vmem>>, vector<128x1xf32>
      tpu.vector_store %arg9[%c0_29, %c0_30], %45 {strides = array<i32>} : memref<128x1xf32, #tpu.memory_space<vmem>>, vector<128x1xf32>,
      %cst_31 = arith.constant 1.000000e+30 : f32
      %47 = vector.broadcast %cst_31 : f32 to vector<128x1xf32>
      %c0_32 = arith.constant 0 : index
      %c0_33 = arith.constant 0 : index
      %48 = vector.load %arg10[%c0_32, %c0_33] : memref<128x1xf32, #tpu.memory_space<vmem>>, vector<128x1xf32>
      tpu.vector_store %arg10[%c0_32, %c0_33], %47 {strides = array<i32>} : memref<128x1xf32, #tpu.memory_space<vmem>>, vector<128x1xf32>,
    } else {
    }
    %c0 = arith.constant 0 : index
    %c0_1 = arith.constant 0 : index
    %3 = vector.load %arg2[%c0, %c0_1] : memref<128x128xf32, #tpu.memory_space<vmem>>, vector<128x128xf32>
    %c0_2 = arith.constant 0 : index
    %c0_3 = arith.constant 0 : index
    %4 = vector.load %arg3[%c0_2, %c0_3] : memref<128x128xf32, #tpu.memory_space<vmem>>, vector<128x128xf32>
    %cst = arith.constant dense<0.000000e+00> : vector<128x128xf32>
    %5 = tpu.matmul %3, %4, %cst {dimension_numbers = #tpu.dot_dimension_numbers<[1], [1], [0], [0], [0, 0, 1, 0], [], []>} : vector<128x128xf32>, vector<128x128xf32>, vector<128x128xf32> -> vector<128x128xf32>
    %c0_4 = arith.constant 0 : index
    %c0_5 = arith.constant 0 : index
    %6 = vector.load %arg4[%c0_4, %c0_5] : memref<128x1xf32, #tpu.memory_space<vmem>>, vector<128x1xf32>
    %c0_6 = arith.constant 0 : index
    %c0_7 = arith.constant 0 : index
    %7 = vector.load %arg5[%c0_6, %c0_7] : memref<1x128xf32, #tpu.memory_space<vmem>>, vector<1x128xf32>
    %8 = vector.broadcast %6 : vector<128x1xf32> to vector<128x128xf32>
    %9 = vector.broadcast %7 : vector<1x128xf32> to vector<128x128xf32>
    %10 = arith.addf %8, %9 : vector<128x128xf32>
    %cst_8 = arith.constant 2.000000e+00 : f32
    %11 = vector.broadcast %cst_8 : f32 to vector<128x128xf32>
    %12 = arith.mulf %11, %5 : vector<128x128xf32>
    %13 = arith.subf %10, %12 : vector<128x128xf32>
    %c0_9 = arith.constant 0 : index
    %c0_10 = arith.constant 0 : index
    %14 = vector.load %arg6[%c0_9, %c0_10] : memref<128x1xi32, #tpu.memory_space<vmem>>, vector<128x1xi32>
    %c0_11 = arith.constant 0 : index
    %c0_12 = arith.constant 0 : index
    %15 = vector.load %arg7[%c0_11, %c0_12] : memref<1x128xi32, #tpu.memory_space<vmem>>, vector<1x128xi32>
    %16 = vector.broadcast %14 : vector<128x1xi32> to vector<128x128xi32>
    %17 = vector.broadcast %15 : vector<1x128xi32> to vector<128x128xi32>
    %18 = arith.cmpi eq, %16, %17 : vector<128x128xi32>
    %c128_i32 = arith.constant 128 : i32
    %19 = arith.muli %arg1, %c128_i32 : i32
    %20 = tpu.iota {dimensions = array<i32: 1>} : vector<128x128xi32>
    %21 = vector.broadcast %19 : i32 to vector<128x128xi32>
    %22 = arith.addi %21, %20 : vector<128x128xi32>
    %c8_i32 = arith.constant 8 : i32
    %23 = vector.broadcast %c8_i32 : i32 to vector<128x128xi32>
    %24 = arith.cmpi slt, %22, %23 : vector<128x128xi32>
    %25 = arith.andi %18, %24 : vector<128x128xi1>
    %cst_13 = arith.constant dense<true> : vector<128x128xi1>
    %26 = arith.xori %18, %cst_13 : vector<128x128xi1>
    %27 = arith.andi %26, %24 : vector<128x128xi1>
    %c0_14 = arith.constant 0 : index
    %c0_15 = arith.constant 0 : index
    %28 = vector.load %arg9[%c0_14, %c0_15] : memref<128x1xf32, #tpu.memory_space<vmem>>, vector<128x1xf32>
    %cst_16 = arith.constant -1.000000e+30 : f32
    %29 = vector.broadcast %cst_16 : f32 to vector<128x128xf32>
    %30 = arith.select %25, %13, %29 : vector<128x128xi1>, vector<128x128xf32>
    %cst_17 = arith.constant dense<0xFF800000> : vector<128xf32>
    %31 = vector.multi_reduction <maximumf>, %30, %cst_17 [1] : vector<128x128xf32> to vector<128xf32>
    %32 = vector.shape_cast %31 : vector<128xf32> to vector<128x1xf32>
    %33 = arith.maximumf %28, %32 : vector<128x1xf32>
    %c0_18 = arith.constant 0 : index
    %c0_19 = arith.constant 0 : index
    %34 = vector.load %arg9[%c0_18, %c0_19] : memref<128x1xf32, #tpu.memory_space<vmem>>, vector<128x1xf32>
    tpu.vector_store %arg9[%c0_18, %c0_19], %33 {strides = array<i32>} : memref<128x1xf32, #tpu.memory_space<vmem>>, vector<128x1xf32>,
    %c0_20 = arith.constant 0 : index
    %c0_21 = arith.constant 0 : index
    %35 = vector.load %arg10[%c0_20, %c0_21] : memref<128x1xf32, #tpu.memory_space<vmem>>, vector<128x1xf32>
    %cst_22 = arith.constant 1.000000e+30 : f32
    %36 = vector.broadcast %cst_22 : f32 to vector<128x128xf32>
    %37 = arith.select %27, %13, %36 : vector<128x128xi1>, vector<128x128xf32>
    %cst_23 = arith.constant dense<0x7F800000> : vector<128xf32>
    %38 = vector.multi_reduction <minimumf>, %37, %cst_23 [1] : vector<128x128xf32> to vector<128xf32>
    %39 = vector.shape_cast %38 : vector<128xf32> to vector<128x1xf32>
    %40 = arith.minimumf %35, %39 : vector<128x1xf32>
    %c0_24 = arith.constant 0 : index
    %c0_25 = arith.constant 0 : index
    %41 = vector.load %arg10[%c0_24, %c0_25] : memref<128x1xf32, #tpu.memory_space<vmem>>, vector<128x1xf32>
    tpu.vector_store %arg10[%c0_24, %c0_25], %40 {strides = array<i32>} : memref<128x1xf32, #tpu.memory_space<vmem>>, vector<128x1xf32>,
    %c0_i32_26 = arith.constant 0 : i32
    %42 = arith.cmpi eq, %arg1, %c0_i32_26 : i32
    %43 = arith.extui %42 : i1 to i32
    %c0_i32_27 = arith.constant 0 : i32
    %44 = arith.cmpi ne, %43, %c0_i32_27 : i32
    scf.if %44 {
      %c0_28 = arith.constant 0 : index
      %c0_29 = arith.constant 0 : index
      %45 = vector.load %arg9[%c0_28, %c0_29] : memref<128x1xf32, #tpu.memory_space<vmem>>, vector<128x1xf32>
      %cst_30 = arith.constant 9.99999996E-13 : f32
      %46 = vector.broadcast %cst_30 : f32 to vector<128x1xf32>
      %47 = arith.maximumf %45, %46 : vector<128x1xf32>
      %48 = math.sqrt %47 : vector<128x1xf32>
      %c0_31 = arith.constant 0 : index
      %c0_32 = arith.constant 0 : index
      %49 = vector.load %arg10[%c0_31, %c0_32] : memref<128x1xf32, #tpu.memory_space<vmem>>, vector<128x1xf32>
      %cst_33 = arith.constant 9.99999996E-13 : f32
      %50 = vector.broadcast %cst_33 : f32 to vector<128x1xf32>
      %51 = arith.maximumf %49, %50 : vector<128x1xf32>
      %52 = math.sqrt %51 : vector<128x1xf32>
      %53 = arith.subf %48, %52 : vector<128x1xf32>
      %cst_34 = arith.constant 3.000000e-01 : f32
      %54 = vector.broadcast %cst_34 : f32 to vector<128x1xf32>
      %55 = arith.addf %53, %54 : vector<128x1xf32>
      %cst_35 = arith.constant 0.000000e+00 : f32
      %56 = vector.broadcast %cst_35 : f32 to vector<128x1xf32>
      %57 = arith.maximumf %55, %56 : vector<128x1xf32>
      %c128_i32_36 = arith.constant 128 : i32
      %58 = arith.muli %arg0, %c128_i32_36 : i32
      %59 = tpu.iota {dimensions = array<i32: 0>} : vector<128x1xi32>
      %60 = vector.broadcast %58 : i32 to vector<128x1xi32>
      %61 = arith.addi %60, %59 : vector<128x1xi32>
      %c8_i32_37 = arith.constant 8 : i32
      %62 = vector.broadcast %c8_i32_37 : i32 to vector<128x1xi32>
      %63 = arith.cmpi slt, %61, %62 : vector<128x1xi32>
      %cst_38 = arith.constant 0.000000e+00 : f32
      %64 = vector.broadcast %cst_38 : f32 to vector<128x1xf32>
      %65 = arith.select %63, %57, %64 : vector<128x1xi1>, vector<128x1xf32>
      %66 = vector.shape_cast %65 : vector<128x1xf32> to vector<1x128x1xf32>
      %cst_39 = arith.constant dense<0.000000e+00> : vector<1xf32>
      %67 = vector.multi_reduction <add>, %66, %cst_39 [1, 2] : vector<1x128x1xf32> to vector<1xf32>
      %68 = vector.shape_cast %67 : vector<1xf32> to vector<1x1x1xf32>
      %69 = vector.extract %68[0, 0, 0] : f32 from vector<1x1x1xf32>
      %70 = vector.broadcast %69 : f32 to vector<1x8x128xf32>
      %c0_40 = arith.constant 0 : index
      %c0_41 = arith.constant 0 : index
      %c0_42 = arith.constant 0 : index
      %71 = vector.load %arg8[%c0_40, %c0_41, %c0_42] : memref<1x8x128xf32, #tpu.memory_space<vmem>>, vector<1x8x128xf32>
      tpu.vector_store %arg8[%c0_40, %c0_41, %c0_42], %70 {strides = array<i32>} : memref<1x8x128xf32, #tpu.memory_space<vmem>>, vector<1x8x128xf32>,
    } else {
    }
    return
  }
  func.func @transform_0(%arg0: i32, %arg1: i32) -> (i32, i32) {
    %c0_i32 = arith.constant 0 : i32
    %c0_i32_0 = arith.constant 0 : i32
    return %arg0, %c0_i32 : i32, i32
  }
  func.func @transform_1(%arg0: i32, %arg1: i32) -> (i32, i32) {
    %c0_i32 = arith.constant 0 : i32
    %c0_i32_0 = arith.constant 0 : i32
    return %arg1, %c0_i32 : i32, i32
  }
  func.func @transform_2(%arg0: i32, %arg1: i32) -> (i32, i32) {
    %c0_i32 = arith.constant 0 : i32
    %c0_i32_0 = arith.constant 0 : i32
    return %arg0, %c0_i32 : i32, i32
  }
  func.func @transform_3(%arg0: i32, %arg1: i32) -> (i32, i32) {
    %c0_i32 = arith.constant 0 : i32
    %c0_i32_0 = arith.constant 0 : i32
    return %c0_i32, %arg1 : i32, i32
  }
  func.func @transform_4(%arg0: i32, %arg1: i32) -> (i32, i32) {
    %c0_i32 = arith.constant 0 : i32
    %c0_i32_0 = arith.constant 0 : i32
    return %arg0, %c0_i32 : i32, i32
  }
  func.func @transform_5(%arg0: i32, %arg1: i32) -> (i32, i32) {
    %c0_i32 = arith.constant 0 : i32
    %c0_i32_0 = arith.constant 0 : i32
    return %c0_i32, %arg1 : i32, i32
  }
  func.func @transform_6(%arg0: i32, %arg1: i32) -> (i32, i32, i32) {
    %c0_i32 = arith.constant 0 : i32
    %c0_i32_0 = arith.constant 0 : i32
    %c0_i32_1 = arith.constant 0 : i32
    return %arg0, %c0_i32, %c0_i32_0 : i32, i32, i32
  }
}

</mosaic_0001>

<bundles_post_ra>
// kernel: tpu_custom_call.1
= control target key start
LH: loop header
LB: loop body
LE: loop exit
PB: predicated region body
PF: predicated region fallthrough
CT: control target
= control target key end

     0   :  { %v1340_v3 = vmov 0   ;;  %s2043_s0 = inlined_call_operand.vmem [shape: f32[128,128], index: 0, kind: input, shape index: {}]   ;;  %s2044_s1 = inlined_call_operand.vmem [shape: f32[128,128], index: 1, kind: input, shape index: {}]   ;;  %s2045_s2 = inlined_call_operand.vmem [shape: f32[128,1], index: 2, kind: input, shape index: {}]   ;;  %s2046_s3 = inlined_call_operand.vmem [shape: f32[1,128], index: 3, kind: input, shape index: {}]   ;;  %s2047_s4 = inlined_call_operand.vmem [shape: s32[128,1], index: 4, kind: input, shape index: {}]   ;;  %s2048_s5 = inlined_call_operand.vmem [shape: s32[1,128], index: 5, kind: input, shape index: {}]   ;;  %s2049_s6 = inlined_call_operand.hbm [shape: f32[1,8,128], index: 6, kind: output, shape index: {}]  }
   0x1   :  { %v92_v0 = vld [vmem:[%s2044_s1 + $0x78] sm:$0xff]  ;;  %v91_v1 = vld [vmem:[%s2044_s1 + $0x70] sm:$0xff]  ;;  %v90_v2 = vld [vmem:[%s2044_s1 + $0x68] sm:$0xff]  ;;  %1312 = vset.pattern.permute.xlu0 %v1340_v3  ;;  %1313 = vset.pattern.permute.xlu1 %v1340_v3 }
   0x2   :  { %1217 = vmatprep.subr.mxu0 %v92_v0  ;;  %1273 = vmatprep.subr.mxu1 %v92_v0  ;;  %v238_v4 = vld [vmem:[%s2045_s2] sm:$0xff]  ;;  %v88_v9 = vld [vmem:[%s2044_s1 + $0x58] sm:$0xff]  ;;  %v239_v10 = vld [vmem:[%s2045_s2 + $0x8] sm:$0xff] }
   0x3   :  { %1218 = vmatpush3.xpose.msra.mxu0 %v92_v0  ;;  %1289 = vmatpush3.xpose.msra.mxu1 %v92_v0  ;;  %v61_v5 = vld [vmem:[%s2043_s0] sm:$0xff]  ;;  %v87_v11 = vld [vmem:[%s2044_s1 + $0x50] sm:$0xff]  ;;  %v241_v12 = vld [vmem:[%s2045_s2 + $0x18] sm:$0xff] }
   0x4   :  { %1219 = vmatprep.subr.mxu0 %v91_v1  ;;  %1274 = vmatprep.subr.mxu1 %v91_v1  ;;  %v69_v6 = vld [vmem:[%s2043_s0 + $0x40] sm:$0xff] }
   0x5   :  { %v89_v7 = vld [vmem:[%s2044_s1 + $0x60] sm:$0xff]  ;;  %257 = vperm.xlu0 %1312, %v238_v4   ;;  %1249 = vmatprep.mubr.f32.mxu0 %v61_v5 }
   0x6   :  { %1261 = vmatprep.mubr.f32.mxu1 %v69_v6  ;;  %v389_v8 = vld [vmem:[%s2047_s4] sm:$0xff] }
   0x7   :  { %1220 = vmatpush3.xpose.msra.mxu0 %v91_v1  ;;  %1290 = vmatpush3.xpose.msra.mxu1 %v91_v1 }
   0x8   :  { %1221 = vmatprep.subr.mxu0 %v90_v2  ;;  %1275 = vmatprep.subr.mxu1 %v90_v2 }
   0x9   :  { %407 = vperm.xlu0 %1312, %v389_v8  }
   0xb   :  { %1222 = vmatpush3.xpose.msra.mxu0 %v90_v2  ;;  %1291 = vmatpush3.xpose.msra.mxu1 %v90_v2 }
   0xc   :  { %1223 = vmatprep.subr.mxu0 %v89_v7  ;;  %1276 = vmatprep.subr.mxu1 %v89_v7 }
   0xd   :  { %262 = vperm.xlu0 %1312, %v239_v10  }
   0xf   :  { %1224 = vmatpush3.xpose.msra.mxu0 %v89_v7  ;;  %1292 = vmatpush3.xpose.msra.mxu1 %v89_v7 }
  0x10   :  { %1225 = vmatprep.subr.mxu0 %v88_v9  ;;  %1277 = vmatprep.subr.mxu1 %v88_v9 }
  0x11   :  { %11 = vsyncpa [#allocation5], 0  ;;  %v86_v13 = vld [vmem:[%s2044_s1 + $0x48] sm:$0xff]  ;;  %272 = vperm.xlu0 %1312, %v241_v12   ;;  %v242_v14 = vld [vmem:[%s2045_s2 + $0x20] sm:$0xff]  ;;  %v475_v63 = vlaneseq  ;;  %vm1341_vm2 = vmmov 1   ;;  %vm2050_vm13 = vcmask 7168  }
  0x12   :  { %v85_v15 = vld [vmem:[%s2044_s1 + $0x40] sm:$0xff]  ;;  %v243_v16 = vld [vmem:[%s2045_s2 + $0x28] sm:$0xff]  ;;  %v84_v17 = vld [vmem:[%s2044_s1 + $0x38] sm:$0xff] }
  0x13   :  { %1226 = vmatpush3.xpose.msra.mxu0 %v88_v9  ;;  %1293 = vmatpush3.xpose.msra.mxu1 %v88_v9  ;;  %v244_v18 = vld [vmem:[%s2045_s2 + $0x30] sm:$0xff]  ;;  %v246_v20 = vld [vmem:[%s2045_s2 + $0x40] sm:$0xff]  ;;  %v82_v21 = vld [vmem:[%s2044_s1 + $0x28] sm:$0xff]  ;;  %v1555_v3 = vand.u32 127, %v475_v63 }
  0x14   :  { %1227 = vmatprep.subr.mxu0 %v87_v11  ;;  %1278 = vmatprep.subr.mxu1 %v87_v11  ;;  %v83_v19 = vld [vmem:[%s2044_s1 + $0x30] sm:$0xff]  ;;  %v81_v23 = vld [vmem:[%s2044_s1 + $0x20] sm:$0xff]  ;;  %v80_v25 = vld [vmem:[%s2044_s1 + $0x18] sm:$0xff] }
  0x15   :  { %277 = vperm.xlu0 %1312, %v242_v14   ;;  %v248_v22 = vld [vmem:[%s2045_s2 + $0x50] sm:$0xff]  ;;  %v250_v24 = vld [vmem:[%s2045_s2 + $0x60] sm:$0xff]  ;;  %v390_v28 = vld [vmem:[%s2047_s4 + $0x8] sm:$0xff]  ;;  %vm479_vm4 = vcmp.lt.s32.totalorder %v1555_v3, 8 }
  0x16   :  { %v252_v26 = vld [vmem:[%s2045_s2 + $0x70] sm:$0xff]  ;;  %v78_v29 = vld [vmem:[%s2044_s1 + $0x8] sm:$0xff]  ;;  %v392_v30 = vld [vmem:[%s2047_s4 + $0x18] sm:$0xff] }
  0x17   :  { %1228 = vmatpush3.xpose.msra.mxu0 %v87_v11  ;;  %1294 = vmatpush3.xpose.msra.mxu1 %v87_v11  ;;  %v79_v27 = vld [vmem:[%s2044_s1 + $0x10] sm:$0xff]  ;;  %v77_v31 = vld [vmem:[%s2044_s1] sm:$0xff]  ;;  %v394_v32 = vld [vmem:[%s2047_s4 + $0x28] sm:$0xff] }
  0x18   :  { %1229 = vmatprep.subr.mxu0 %v86_v13  ;;  %1279 = vmatprep.subr.mxu1 %v86_v13  ;;  %v396_v33 = vld [vmem:[%s2047_s4 + $0x38] sm:$0xff]  ;;  %v62_v34 = vld [vmem:[%s2043_s0 + $0x8] sm:$0xff]  ;;  %v63_v36 = vld [vmem:[%s2043_s0 + $0x10] sm:$0xff] }
  0x19   :  { %282 = vperm.xlu0 %1312, %v243_v16   ;;  %v70_v35 = vld [vmem:[%s2043_s0 + $0x48] sm:$0xff]  ;;  %v71_v37 = vld [vmem:[%s2043_s0 + $0x50] sm:$0xff]  ;;  %v64_v39 = vld [vmem:[%s2043_s0 + $0x18] sm:$0xff] }
  0x1a   :  { %v398_v38 = vld [vmem:[%s2047_s4 + $0x48] sm:$0xff]  ;;  %v72_v40 = vld [vmem:[%s2043_s0 + $0x58] sm:$0xff]  ;;  %v65_v41 = vld [vmem:[%s2043_s0 + $0x20] sm:$0xff] }
  0x1b   :  { %1230 = vmatpush3.xpose.msra.mxu0 %v86_v13  ;;  %1295 = vmatpush3.xpose.msra.mxu1 %v86_v13  ;;  %v73_v42 = vld [vmem:[%s2043_s0 + $0x60] sm:$0xff]  ;;  %v400_v43 = vld [vmem:[%s2047_s4 + $0x58] sm:$0xff]  ;;  %v66_v44 = vld [vmem:[%s2043_s0 + $0x28] sm:$0xff] }
  0x1c   :  { %1231 = vmatprep.subr.mxu0 %v85_v15  ;;  %1280 = vmatprep.subr.mxu1 %v85_v15  ;;  %v74_v45 = vld [vmem:[%s2043_s0 + $0x68] sm:$0xff]  ;;  %v67_v46 = vld [vmem:[%s2043_s0 + $0x30] sm:$0xff]  ;;  %v68_v49 = vld [vmem:[%s2043_s0 + $0x38] sm:$0xff] }
  0x1d   :  { %287 = vperm.xlu0 %1312, %v244_v18   ;;  %v75_v47 = vld [vmem:[%s2043_s0 + $0x70] sm:$0xff]  ;;  %v402_v48 = vld [vmem:[%s2047_s4 + $0x68] sm:$0xff]  ;;  %v76_v50 = vld [vmem:[%s2043_s0 + $0x78] sm:$0xff] }
  0x1e   :  { %v404_v51 = vld [vmem:[%s2047_s4 + $0x78] sm:$0xff]  ;;  %v1548_v0 = vld [vmem:[%s2048_s5] ss:$0 sm:$0xff] }
  0x1f   :  { %1232 = vmatpush3.xpose.msra.mxu0 %v85_v15  ;;  %1296 = vmatpush3.xpose.msra.mxu1 %v85_v15  ;;  %v1553_v2 = vld [vmem:[%s2046_s3] ss:$0 sm:$0xff] }
  0x20   :  { %1233 = vmatprep.subr.mxu0 %v84_v17  ;;  %1281 = vmatprep.subr.mxu1 %v84_v17 }
  0x21   :  { %297 = vperm.xlu0 %1312, %v246_v20  }
  0x23   :  { %1234 = vmatpush3.xpose.msra.mxu0 %v84_v17  ;;  %1297 = vmatpush3.xpose.msra.mxu1 %v84_v17 }
  0x24   :  { %1235 = vmatprep.subr.mxu0 %v83_v19  ;;  %1282 = vmatprep.subr.mxu1 %v83_v19 }
  0x25   :  { %307 = vperm.xlu0 %1312, %v248_v22  }
  0x27   :  { %1236 = vmatpush3.xpose.msra.mxu0 %v83_v19  ;;  %1298 = vmatpush3.xpose.msra.mxu1 %v83_v19 }
  0x28   :  { %1237 = vmatprep.subr.mxu0 %v82_v21  ;;  %1283 = vmatprep.subr.mxu1 %v82_v21 }
  0x29   :  { %317 = vperm.xlu0 %1312, %v250_v24  }
  0x2b   :  { %1238 = vmatpush3.xpose.msra.mxu0 %v82_v21  ;;  %1299 = vmatpush3.xpose.msra.mxu1 %v82_v21 }
  0x2c   :  { %1239 = vmatprep.subr.mxu0 %v81_v23  ;;  %1284 = vmatprep.subr.mxu1 %v81_v23 }
  0x2d   :  { %327 = vperm.xlu0 %1312, %v252_v26  }
  0x2f   :  { %1240 = vmatpush3.xpose.msra.mxu0 %v81_v23  ;;  %1300 = vmatpush3.xpose.msra.mxu1 %v81_v23 }
  0x30   :  { %1241 = vmatprep.subr.mxu0 %v80_v25  ;;  %1285 = vmatprep.subr.mxu1 %v80_v25 }
  0x31   :  { %410 = vperm.xlu0 %1312, %v390_v28  }
  0x33   :  { %1242 = vmatpush3.xpose.msra.mxu0 %v80_v25  ;;  %1301 = vmatpush3.xpose.msra.mxu1 %v80_v25 }
  0x34   :  { %1243 = vmatprep.subr.mxu0 %v79_v27  ;;  %1286 = vmatprep.subr.mxu1 %v79_v27 }
  0x35   :  { %416 = vperm.xlu0 %1312, %v392_v30   ;;  %v1342_v30 = vmov -1e+30  }
  0x36   :  { %30 = vst.msk [vmem:[#allocation2 + $0x8] sm:$0xff] %vm2050_vm13, %v1342_v30  ;;  %29 = vst.msk [vmem:[#allocation2] sm:$0xff] %vm2050_vm13, %v1342_v30 }
  0x37   :  { %1244 = vmatpush3.xpose.msra.mxu0 %v79_v27  ;;  %1302 = vmatpush3.xpose.msra.mxu1 %v79_v27  ;;  %31 = vst.msk [vmem:[#allocation2 + $0x10] sm:$0xff] %vm2050_vm13, %v1342_v30  ;;  %32 = vst.msk [vmem:[#allocation2 + $0x18] sm:$0xff] %vm2050_vm13, %v1342_v30 }
  0x38   :  { %1245 = vmatprep.subr.mxu0 %v78_v29  ;;  %1287 = vmatprep.subr.mxu1 %v78_v29  ;;  %33 = vst.msk [vmem:[#allocation2 + $0x20] sm:$0xff] %vm2050_vm13, %v1342_v30  ;;  %34 = vst.msk [vmem:[#allocation2 + $0x28] sm:$0xff] %vm2050_vm13, %v1342_v30 }
  0x39   :  { %422 = vperm.xlu0 %1312, %v394_v32   ;;  %35 = vst.msk [vmem:[#allocation2 + $0x30] sm:$0xff] %vm2050_vm13, %v1342_v30  ;;  %36 = vst.msk [vmem:[#allocation2 + $0x38] sm:$0xff] %vm2050_vm13, %v1342_v30 }
  0x3a   :  { %37 = vst.msk [vmem:[#allocation2 + $0x40] sm:$0xff] %vm2050_vm13, %v1342_v30  ;;  %38 = vst.msk [vmem:[#allocation2 + $0x48] sm:$0xff] %vm2050_vm13, %v1342_v30 }
  0x3b   :  { %1246 = vmatpush3.xpose.msra.mxu0 %v78_v29  ;;  %1303 = vmatpush3.xpose.msra.mxu1 %v78_v29  ;;  %39 = vst.msk [vmem:[#allocation2 + $0x50] sm:$0xff] %vm2050_vm13, %v1342_v30  ;;  %40 = vst.msk [vmem:[#allocation2 + $0x58] sm:$0xff] %vm2050_vm13, %v1342_v30 }
  0x3c   :  { %1247 = vmatprep.subr.mxu0 %v77_v31  ;;  %1288 = vmatprep.subr.mxu1 %v77_v31  ;;  %41 = vst.msk [vmem:[#allocation2 + $0x60] sm:$0xff] %vm2050_vm13, %v1342_v30  ;;  %42 = vst.msk [vmem:[#allocation2 + $0x68] sm:$0xff] %vm2050_vm13, %v1342_v30 }
  0x3d   :  { %428 = vperm.xlu0 %1312, %v396_v33   ;;  %43 = vst.msk [vmem:[#allocation2 + $0x70] sm:$0xff] %vm2050_vm13, %v1342_v30  ;;  %44 = vst.msk [vmem:[#allocation2 + $0x78] sm:$0xff] %vm2050_vm13, %v1342_v30 }
  0x3f   :  { %1248 = vmatpush3.xpose.msra.mxu0 %v77_v31  ;;  %1304 = vmatpush3.xpose.msra.mxu1 %v77_v31 }
  0x41   :  { %434 = vperm.xlu0 %1312, %v398_v38   ;;  %v1343_v38 = vmov 1e+30  }
  0x42   :  { %1250 = vmatmul.mubr.f32.vlgmr.msra.gmra.mxu0 %v62_v34  ;;  %1262 = vmatmul.mubr.f32.vlgmr.msra.gmra.mxu1 %v70_v35  ;;  %45 = vst.msk [vmem:[#allocation3] sm:$0xff] %vm2050_vm13, %v1343_v38  ;;  %46 = vst.msk [vmem:[#allocation3 + $0x8] sm:$0xff] %vm2050_vm13, %v1343_v38 }
  0x43   :  { %1252 = vmatprep.mubr.f32.mxu0 %v63_v36  ;;  %1264 = vmatprep.mubr.f32.mxu1 %v71_v37  ;;  %47 = vst.msk [vmem:[#allocation3 + $0x10] sm:$0xff] %vm2050_vm13, %v1343_v38  ;;  %48 = vst.msk [vmem:[#allocation3 + $0x18] sm:$0xff] %vm2050_vm13, %v1343_v38 }
  0x44   :  { %49 = vst.msk [vmem:[#allocation3 + $0x20] sm:$0xff] %vm2050_vm13, %v1343_v38  ;;  %50 = vst.msk [vmem:[#allocation3 + $0x28] sm:$0xff] %vm2050_vm13, %v1343_v38 }
  0x45   :  { %440 = vperm.xlu0 %1312, %v400_v43   ;;  %51 = vst.msk [vmem:[#allocation3 + $0x30] sm:$0xff] %vm2050_vm13, %v1343_v38  ;;  %52 = vst.msk [vmem:[#allocation3 + $0x38] sm:$0xff] %vm2050_vm13, %v1343_v38  ;;  %v247_v43 = vld [vmem:[%s2045_s2 + $0x48] sm:$0xff] }
  0x46   :  { %1253 = vmatmul.mubr.f32.gmra.mxu0 %v64_v39  ;;  %1265 = vmatmul.mubr.f32.gmra.mxu1 %v72_v40  ;;  %53 = vst.msk [vmem:[#allocation3 + $0x40] sm:$0xff] %vm2050_vm13, %v1343_v38  ;;  %54 = vst.msk [vmem:[#allocation3 + $0x48] sm:$0xff] %vm2050_vm13, %v1343_v38 }
  0x47   :  { %1255 = vmatprep.mubr.f32.mxu0 %v65_v41  ;;  %1267 = vmatprep.mubr.f32.mxu1 %v73_v42  ;;  %55 = vst.msk [vmem:[#allocation3 + $0x50] sm:$0xff] %vm2050_vm13, %v1343_v38  ;;  %56 = vst.msk [vmem:[#allocation3 + $0x58] sm:$0xff] %vm2050_vm13, %v1343_v38  ;;  %v240_v41 = vld [vmem:[%s2045_s2 + $0x10] sm:$0xff]  ;;  %v245_v42 = vld [vmem:[%s2045_s2 + $0x38] sm:$0xff] }
  0x48   :  { %57 = vst.msk [vmem:[#allocation3 + $0x60] sm:$0xff] %vm2050_vm13, %v1343_v38  ;;  %58 = vst.msk [vmem:[#allocation3 + $0x68] sm:$0xff] %vm2050_vm13, %v1343_v38 }
  0x49   :  { %446 = vperm.xlu0 %1312, %v402_v48   ;;  %59 = vst.msk [vmem:[#allocation3 + $0x70] sm:$0xff] %vm2050_vm13, %v1343_v38  ;;  %60 = vst.msk [vmem:[#allocation3 + $0x78] sm:$0xff] %vm2050_vm13, %v1343_v38  ;;  %v393_v48 = vld [vmem:[%s2047_s4 + $0x20] sm:$0xff] }
  0x4a   :  { %1256 = vmatmul.mubr.f32.gmra.mxu0 %v66_v44  ;;  %1268 = vmatmul.mubr.f32.gmra.mxu1 %v74_v45  ;;  %v249_v44 = vld [vmem:[%s2045_s2 + $0x58] sm:$0xff]  ;;  %v251_v45 = vld [vmem:[%s2045_s2 + $0x68] sm:$0xff] }
  0x4b   :  { %1258 = vmatprep.mubr.f32.mxu0 %v67_v46  ;;  %1270 = vmatprep.mubr.f32.mxu1 %v75_v47  ;;  %v253_v46 = vld [vmem:[%s2045_s2 + $0x78] sm:$0xff]  ;;  %v391_v47 = vld [vmem:[%s2047_s4 + $0x10] sm:$0xff] }
  0x4d   :  { %452 = vperm.xlu0 %1312, %v404_v51   ;;  %v399_v51 = vld [vmem:[%s2047_s4 + $0x50] sm:$0xff] }
  0x4e   :  { %1259 = vmatmul.mubr.f32.gmra.mxu0 %v68_v49  ;;  %1271 = vmatmul.mubr.f32.gmra.mxu1 %v76_v50  ;;  %v395_v49 = vld [vmem:[%s2047_s4 + $0x30] sm:$0xff]  ;;  %v397_v50 = vld [vmem:[%s2047_s4 + $0x40] sm:$0xff] }
  0x80   :  { %v258_v52 = vpop.permute.xlu0 %257 }
  0x81   :  { %v341_v10 = vadd.f32 %v1553_v2, %v258_v52  ;;  %v401_v52 = vld [vmem:[%s2047_s4 + $0x60] sm:$0xff] }
  0x84   :  { %v408_v53 = vpop.permute.xlu0 %407 }
  0x85   :  { %vm458_vm1 = vcmp.eq.s32.totalorder %v408_v53, %v1548_v0  ;;  %v403_v53 = vld [vmem:[%s2047_s4 + $0x70] sm:$0xff]  ;;  %s1344_s4 = smov [#allocation4]  }
  0x86   :  { %vm1567_vm5 = vmxor %vm458_vm1, %vm1341_vm2  ;;  %s1175_s25 = sshll.u32 %s1344_s4, 4  ;;  %s1176_s25 = int_to_ptr.vmem [resolvable:$true] %s1175_s25 }
  0x87   :  { %vm480_vm9 = vmand %vm458_vm1, %vm479_vm4  ;;  %s1318_s27 = scalar_lea.vmem %s1176_s25, 128  ;;  %p1323_p1 = scmp.lt.s32.totalorder %s1176_s25, %s1176_s25 }
  0x88   :  { %v263_v54 = vpop.permute.xlu0 %262  ;;  %vm1608_vm12 = vmand %vm1567_vm5, %vm479_vm4  ;;  %p1319_p0 = scmp.ne.s32.totalorder %s1176_s25, %s1318_s27  ;;  %p1324_p2 = scmp.lt.s32.totalorder %s1318_s27, %s1318_s27 }
  0x89   :  { %v342_v4 = vadd.f32 %v1553_v2, %v263_v54 }
  0x8a   :  { %p1325_p3 = por %p1324_p2, %p1323_p1 }
  0x8c   :  { %v273_v55 = vpop.permute.xlu0 %272  ;;  %p1326_p4 = pnand %p1325_p3, %p1319_p0 }
  0x8d   :  { %v344_v18 = vadd.f32 %v1553_v2, %v273_v55 }
  0x90   :  { %v1533_v56 = vpop.permute.xlu0 %277 }
  0x94   :  { %v283_v57 = vpop.permute.xlu0 %282 }
  0x95   :  { %v346_v28 = vadd.f32 %v1553_v2, %v283_v57 }
  0x98   :  { %v1535_v58 = vpop.permute.xlu0 %287 }
  0x9c   :  { %v1537_v59 = vpop.permute.xlu0 %297 }
  0xa0   :  { %v1539_v60 = vpop.permute.xlu0 %307 }
  0xa4   :  { %v1541_v61 = vpop.permute.xlu0 %317 }
  0xa8   :  { %v1543_v62 = vpop.permute.xlu0 %327 }
  0xac   :  { %v411_v1 = vpop.permute.xlu0 %410 }
  0xad   :  { %vm459_vm0 = vcmp.eq.s32.totalorder %v411_v1, %v1548_v0 }
  0xae   :  { %vm497_vm3 = vmxor %vm459_vm0, %vm1341_vm2 }
  0xaf   :  { %vm1577_vm7 = vmand %vm497_vm3, %vm479_vm4 }
  0xb0   :  { %v417_v5 = vpop.permute.xlu0 %416  ;;  %vm481_vm8 = vmand %vm459_vm0, %vm479_vm4 }
  0xb1   :  { %vm461_vm6 = vcmp.eq.s32.totalorder %v417_v5, %v1548_v0 }
  0xb2   :  { %vm1594_vm10 = vmxor %vm461_vm6, %vm1341_vm2 }
  0xb3   :  { %vm1618_vm14 = vmand %vm461_vm6, %vm479_vm4 }
  0xb4   :  { %v423_v20 = vpop.permute.xlu0 %422  ;;  %vm1643_vm15 = vmand %vm1594_vm10, %vm479_vm4 }
  0xb5   :  { %vm463_vm11 = vcmp.eq.s32.totalorder %v423_v20, %v1548_v0 }
  0xb6   :  { %vm501_vm0 = vmxor %vm463_vm11, %vm1341_vm2 }
  0xb7   :  { %vm1664_vm1 = vmand %vm463_vm11, %vm479_vm4 }
  0xb8   :  { %vm1670_vm3 = vmand %vm501_vm0, %vm479_vm4  ;;  %v1735_v54 = vpop.permute.xlu0 %428 }
  0xbc   :  { %v1737_v55 = vpop.permute.xlu0 %434 }
  0xc0   :  { %v1739_v57 = vpop.permute.xlu0 %440 }
  0xc4   :  { %v1741_v63 = vpop.permute.xlu0 %446 }
  0xc8   :  { %v1743_v1 = vpop.permute.xlu0 %452 }
 0x102   :  { %v1251_v6 = vpop.f32.mrf.mxu0 }
 0x103   :  { %v358_v7 = vmul.f32 2.0, %v1251_v6  ;;  %v528_v6 = vld [vmem:[#allocation2] sm:$0xff] }
 0x104   :  { %v159_v9 = vpop.f32.mrf.mxu0 }
 0x105   :  { %v357_v11 = vmul.f32 2.0, %v159_v9  ;;  %v1573_v12 = vsub.f32 %v342_v4, %v358_v7  ;;  %v529_v4 = vld [vmem:[#allocation2 + $0x8] sm:$0xff] }
 0x106   :  { %v1254_v14 = vpop.f32.mrf.mxu0 }
 0x107   :  { %v360_v15 = vmul.f32 2.0, %v1254_v14  ;;  %v545_v16 = vsel %vm481_vm8, %v1573_v12, -1e+30  ;;  %v373_v17 = vsub.f32 %v341_v10, %v357_v11  ;;  %v642_v22 = vsel %vm1577_vm7, %v1573_v12, 1e+30  ;;  %v625_v10 = vld [vmem:[#allocation3] sm:$0xff] }
 0x108   :  { %562 = vmax.xlane.f32.xlu0 %v545_v16  ;;  %v1598_v21 = vpop.f32.mrf.mxu0 }
 0x109   :  { %v544_v23 = vsel %vm480_vm9, %v373_v17, -1e+30  ;;  %v1612_v26 = vsub.f32 %v344_v18, %v360_v15  ;;  %v641_v34 = vsel %vm1608_vm12, %v373_v17, 1e+30 }
 0x10a   :  { %560 = vmax.xlane.f32.xlu1 %v544_v23  ;;  %v1257_v25 = vpop.f32.mrf.mxu0 }
 0x10b   :  { %v362_v29 = vmul.f32 2.0, %v1257_v25  ;;  %v547_v32 = vsel %vm1618_vm14, %v1612_v26, -1e+30  ;;  %v644_v33 = vsel %vm1643_vm15, %v1612_v26, 1e+30  ;;  %v1754_v25 = vpop.f32.mrf.mxu1 }
 0x10d   :  { %v1658_v35 = vsub.f32 %v346_v28, %v362_v29  ;;  %v199_v30 = vpop.f32.mrf.mxu1 }
 0x10e   :  { %657 = vmin.xlane.f32.xlu1 %v641_v34  ;;  %v179_v34 = vpop.f32.mrf.mxu0 }
 0x10f   :  { %v549_v39 = vsel %vm1664_vm1, %v1658_v35, -1e+30  ;;  %v646_v40 = vsel %vm1670_vm3, %v1658_v35, 1e+30 }
 0x11f   :  { %267 = vperm.xlu1 %1313, %v240_v41  }
 0x123   :  { %292 = vperm.xlu1 %1313, %v245_v42  }
 0x127   :  { %302 = vperm.xlu1 %1313, %v247_v43   ;;  %v359_v43 = vmul.f32 2.0, %v1598_v21  ;;  %v361_v21 = vmul.f32 2.0, %v179_v34 }
 0x12b   :  { %312 = vperm.xlu1 %1313, %v249_v44  }
 0x12f   :  { %322 = vperm.xlu1 %1313, %v251_v45   ;;  %v1762_v45 = vpop.f32.mrf.mxu1 }
 0x130   :  { %v368_v36 = vmul.f32 2.0, %v1762_v45 }
 0x133   :  { %332 = vperm.xlu1 %1313, %v253_v46   ;;  %v1260_v46 = vpop.f32.mrf.mxu0 }
 0x137   :  { %413 = vperm.xlu1 %1313, %v391_v47  }
 0x13b   :  { %419 = vperm.xlu1 %1313, %v393_v48  }
 0x13f   :  { %425 = vperm.xlu1 %1313, %v395_v49  }
 0x143   :  { %431 = vperm.xlu1 %1313, %v397_v50  }
 0x147   :  { %437 = vperm.xlu1 %1313, %v399_v51  }
 0x14b   :  { %443 = vperm.xlu1 %1313, %v401_v52  }
 0x14f   :  { %449 = vperm.xlu1 %1313, %v403_v53  }
 0x191   :  { %v563_v5 = vpop.xlane.xlu0 %562 }
 0x192   :  { %v593_v7 = vmax.f32 %v529_v4, %v563_v5 }
 0x193   :  { %v561_v8 = vpop.xlane.xlu1 %560 }
 0x194   :  { %610 = vst.msk [vmem:[#allocation2 + $0x8] sm:$0xff] %vm2050_vm13, %v593_v7  ;;  %v592_v9 = vmax.f32 %v528_v6, %v561_v8  ;;  %v209_v6 = vpop.f32.mrf.mxu1  ;;  %v189_v7 = vpop.f32.mrf.mxu0 }
 0x196   :  { %609 = vst.msk [vmem:[#allocation2] sm:$0xff] %vm2050_vm13, %v592_v9  ;;  %v345_v9 = vadd.f32 %v1553_v2, %v1533_v56 }
 0x197   :  { %v658_v11 = vpop.xlane.xlu1 %657 }
 0x198   :  { %v689_v14 = vmin.f32 %v625_v10, %v658_v11 }
 0x19a   :  { %705 = vst.msk [vmem:[#allocation3] sm:$0xff] %vm2050_vm13, %v689_v14 }
 0x19b   :  { %v268_v15 = vpop.permute.xlu1 %267 }
 0x19c   :  { %v343_v44 = vadd.f32 %v1553_v2, %v268_v15  ;;  %v363_v15 = vmul.f32 2.0, %v189_v7 }
 0x19d   :  { %v724_v16 = vld [vmem:[#allocation2] sm:$0xff] }
 0x19e   :  { %v740_v17 = vmax.f32 %v724_v16, 1e-12  ;;  %v1768_v53 = vsub.f32 %v343_v44, %v359_v43  ;;  %v1782_v16 = vsub.f32 %v345_v9, %v361_v21 }
 0x19f   :  { %v1748_v18 = vpop.permute.xlu1 %292 }
 0x1a0   :  { %1314 = vrsqrt.f32 %v740_v17  ;;  %vm758_vm5 = vcmp.eq.f32.partialorder %v740_v17, inf  ;;  %v761_v50 = vand.u32 2147483648, %v740_v17  ;;  %vm760_vm9 = vcmp.eq.f32.partialorder %v740_v17, 0.0 }
 0x1a1   :  { %v868_v19 = vld [vmem:[#allocation3] sm:$0xff] }
 0x1a2   :  { %v884_v20 = vmax.f32 %v868_v19, 1e-12  ;;  %v347_v19 = vadd.f32 %v1553_v2, %v1535_v58  ;;  %v349_v58 = vadd.f32 %v1553_v2, %v1537_v59 }
 0x1a3   :  { %v1750_v23 = vpop.permute.xlu1 %302 }
 0x1a4   :  { %1316 = vrsqrt.f32 %v884_v20  ;;  %vm902_vm6 = vcmp.eq.f32.partialorder %v884_v20, inf  ;;  %v905_v51 = vand.u32 2147483648, %v884_v20  ;;  %vm904_vm10 = vcmp.eq.f32.partialorder %v884_v20, 0.0 }
 0x1a7   :  { %v1752_v24 = vpop.permute.xlu1 %312 }
 0x1ab   :  { %v1756_v28 = vpop.permute.xlu1 %322 }
 0x1ad   :  { %v1315_v29 = vpop.eup %1314 }
 0x1ae   :  { %v757_v38 = vmul.f32 %v1315_v29, %v740_v17 }
 0x1af   :  { %v1758_v41 = vpop.permute.xlu1 %332 }
 0x1b0   :  { %v759_v47 = vsel %vm758_vm5, %v740_v17, %v757_v38  ;;  %v1269_v17 = vpop.f32.mrf.mxu1  ;;  %v365_v38 = vmul.f32 2.0, %v199_v30  ;;  %v348_v30 = vadd.f32 %v1553_v2, %v1748_v18  ;;  %v351_v18 = vadd.f32 %v1553_v2, %v1539_v60 }
 0x1b1   :  { %v1317_v42 = vpop.eup %1316  ;;  %v762_v4 = vsel %vm760_vm9, %v761_v50, %v759_v47  ;;  %v367_v50 = vmul.f32 2.0, %v209_v6  ;;  %v352_v6 = vadd.f32 %v1553_v2, %v1752_v24  ;;  %v355_v24 = vadd.f32 %v1553_v2, %v1543_v62 }
 0x1b2   :  { %v901_v48 = vmul.f32 %v1317_v42, %v884_v20  ;;  %v1797_v42 = vsub.f32 %v347_v19, %v363_v15  ;;  %v219_v43 = vpop.f32.mrf.mxu1  ;;  %v370_v9 = vmul.f32 2.0, %v1269_v17  ;;  %v354_v15 = vadd.f32 %v1553_v2, %v1756_v28 }
 0x1b3   :  { %v1764_v49 = vpop.permute.xlu1 %413  ;;  %v1842_v60 = vsub.f32 %v351_v18, %v367_v50 }
 0x1b4   :  { %vm460_vm8 = vcmp.eq.s32.totalorder %v1764_v49, %v1548_v0  ;;  %v903_v52 = vsel %vm902_vm6, %v884_v20, %v901_v48  ;;  %v364_v48 = vmul.f32 2.0, %v1260_v46  ;;  %v1272_v59 = vpop.f32.mrf.mxu1 }
 0x1b5   :  { %v906_v5 = vsel %vm904_vm10, %v905_v51, %v903_v52  ;;  %vm482_vm11 = vmand %vm460_vm8, %vm479_vm4  ;;  %v1817_v51 = vsub.f32 %v349_v58, %v365_v38  ;;  %v350_v52 = vadd.f32 %v1553_v2, %v1750_v23  ;;  %v353_v23 = vadd.f32 %v1553_v2, %v1541_v61  ;;  %v531_v58 = vld [vmem:[#allocation2 + $0x18] sm:$0xff] }
 0x1b6   :  { %v1012_v8 = vsub.f32 %v762_v4, %v906_v5  ;;  %v546_v11 = vsel %vm482_vm11, %v1768_v53, -1e+30  ;;  %vm465_vm11 = vcmp.eq.s32.totalorder %v1735_v54, %v1548_v0  ;;  %v1836_v21 = vsub.f32 %v348_v30, %v364_v48  ;;  %v229_v5 = vpop.f32.mrf.mxu1 }
 0x1b7   :  { %v1777_v10 = vpop.permute.xlu1 %419  ;;  %564 = vmax.xlane.f32.xlu0 %v546_v11  ;;  %v369_v4 = vmul.f32 2.0, %v219_v43  ;;  %vm487_vm1 = vmand %vm465_vm11, %vm479_vm4  ;;  %v371_v7 = vmul.f32 2.0, %v229_v5  ;;  %v372_v19 = vmul.f32 2.0, %v1272_v59  ;;  %v386_v38 = vsub.f32 %v354_v15, %v370_v9  ;;  %v533_v59 = vld [vmem:[#allocation2 + $0x28] sm:$0xff]  ;;  %v542_v9 = vld [vmem:[#allocation2 + $0x70] sm:$0xff] }
 0x1b8   :  { %vm462_vm12 = vcmp.eq.s32.totalorder %v1777_v10, %v1548_v0  ;;  %v1028_v14 = vadd.f32 0.3, %v1012_v8  ;;  %v551_v61 = vsel %vm487_vm1, %v1836_v21, -1e+30  ;;  %vm503_vm7 = vmxor %vm465_vm11, %vm1341_vm2 }
 0x1b9   :  { %vm484_vm0 = vmand %vm462_vm12, %vm479_vm4  ;;  %v1867_v8 = vsub.f32 %v353_v23, %v369_v4  ;;  %v1890_v17 = vsub.f32 %v355_v24, %v371_v7 }
 0x1ba   :  { %v1044_v56 = vmax.f32 %v1028_v14, 0.0  ;;  %v548_v29 = vsel %vm484_vm0, %v1782_v16, -1e+30 }
 0x1bb   :  { %v1791_v20 = vpop.permute.xlu1 %425  ;;  %568 = vmax.xlane.f32.xlu0 %v548_v29  ;;  %v356_v29 = vadd.f32 %v1553_v2, %v1758_v41 }
 0x1bc   :  { %vm464_vm5 = vcmp.eq.s32.totalorder %v1791_v20, %v1548_v0  ;;  %v1127_v34 = vsel %vm2050_vm13, %v1044_v56, 0.0  ;;  %vm469_vm13 = vcmp.eq.s32.totalorder %v1739_v57, %v1548_v0  ;;  %v384_v56 = vsub.f32 %v352_v6, %v368_v36  ;;  %v540_v6 = vld [vmem:[#allocation2 + $0x60] sm:$0xff] }
 0x1bd   :  { %1158 = vadd.xlane.f32.xlu1 %v1127_v34  ;;  %vm486_vm6 = vmand %vm464_vm5, %vm479_vm4  ;;  %v388_v2 = vsub.f32 %v356_v29, %v372_v19 }
 0x1be   :  { %v550_v47 = vsel %vm486_vm6, %v1797_v42, -1e+30  ;;  %vm467_vm6 = vcmp.eq.s32.totalorder %v1737_v55, %v1548_v0  ;;  %vm507_vm3 = vmxor %vm469_vm13, %vm1341_vm2 }
 0x1bf   :  { %v1806_v44 = vpop.permute.xlu1 %431  ;;  %572 = vmax.xlane.f32.xlu0 %v550_v47  ;;  %vm489_vm1 = vmand %vm467_vm6, %vm479_vm4 }
 0x1c0   :  { %vm466_vm9 = vcmp.eq.s32.totalorder %v1806_v44, %v1548_v0  ;;  %vm505_vm11 = vmxor %vm467_vm6, %vm1341_vm2 }
 0x1c1   :  { %566 = vmax.xlane.f32.xlu1 %v547_v32  ;;  %vm488_vm10 = vmand %vm466_vm9, %vm479_vm4  ;;  %v366_v32 = vmul.f32 2.0, %v1754_v25 }
 0x1c2   :  { %v552_v27 = vsel %vm488_vm10, %v1817_v51, -1e+30 }
 0x1c3   :  { %v1828_v46 = vpop.permute.xlu1 %437  ;;  %576 = vmax.xlane.f32.xlu0 %v552_v27  ;;  %v382_v45 = vsub.f32 %v350_v52, %v366_v32 }
 0x1c4   :  { %vm2052_vm14 = vcmp.eq.s32.totalorder %v1828_v46, %v1548_v0 }
 0x1c5   :  { %570 = vmax.xlane.f32.xlu1 %v549_v39  ;;  %vm490_vm0 = vmand %vm2052_vm14, %vm479_vm4  ;;  %v553_v62 = vsel %vm489_vm1, %v382_v45, -1e+30  ;;  %vm2054_vm14 = vcmp.eq.s32.totalorder %v1741_v63, %v1548_v0 }
 0x1c6   :  { %v554_v39 = vsel %vm490_vm0, %v1842_v60, -1e+30  ;;  %vm491_vm1 = vmand %vm469_vm13, %vm479_vm4  ;;  %vm2072_vm13 = vcmp.eq.s32.totalorder %v1741_v63, %v1548_v0 }
 0x1c7   :  { %v1854_v25 = vpop.permute.xlu1 %443  ;;  %580 = vmax.xlane.f32.xlu0 %v554_v39  ;;  %v555_v34 = vsel %vm491_vm1, %v384_v56, -1e+30  ;;  %vm498_vm1 = vmxor %vm460_vm8, %vm1341_vm2 }
 0x1c8   :  { %vm2051_vm10 = vcmp.eq.s32.totalorder %v1854_v25, %v1548_v0  ;;  %vm514_vm8 = vmand %vm498_vm1, %vm479_vm4 }
 0x1c9   :  { %574 = vmax.xlane.f32.xlu1 %v551_v61  ;;  %vm492_vm0 = vmand %vm2051_vm10, %vm479_vm4  ;;  %v643_v13 = vsel %vm514_vm8, %v1768_v53, 1e+30  ;;  %v532_v53 = vld [vmem:[#allocation2 + $0x20] sm:$0xff]  ;;  %v537_v61 = vld [vmem:[#allocation2 + $0x48] sm:$0xff] }
 0x1ca   :  { %v556_v14 = vsel %vm492_vm0, %v1867_v8, -1e+30  ;;  %vm509_vm1 = vmxor %vm2072_vm13, %vm1341_vm2 }
 0x1cb   :  { %v1878_v11 = vpop.permute.xlu1 %449  ;;  %584 = vmax.xlane.f32.xlu0 %v556_v14 }
 0x1cc   :  { %vm2053_vm10 = vcmp.eq.s32.totalorder %v1878_v11, %v1548_v0 }
 0x1cd   :  { %578 = vmax.xlane.f32.xlu1 %v553_v62  ;;  %vm494_vm0 = vmand %vm2053_vm10, %vm479_vm4  ;;  %vm2055_vm10 = vcmp.eq.s32.totalorder %v1743_v1, %v1548_v0 }
 0x1ce   :  { %v558_v28 = vsel %vm494_vm0, %v1890_v17, -1e+30  ;;  %vm493_vm0 = vmand %vm2054_vm14, %vm479_vm4 }
 0x1cf   :  { %588 = vmax.xlane.f32.xlu0 %v558_v28  ;;  %v557_v43 = vsel %vm493_vm0, %v386_v38, -1e+30  ;;  %vm495_vm14 = vmand %vm2055_vm10, %vm479_vm4  ;;  %v541_v28 = vld [vmem:[#allocation2 + $0x68] sm:$0xff] }
 0x1d0   :  { %v559_v12 = vsel %vm495_vm14, %v388_v2, -1e+30  ;;  %vm500_vm0 = vmxor %vm462_vm12, %vm1341_vm2 }
 0x1d1   :  { %582 = vmax.xlane.f32.xlu1 %v555_v34  ;;  %vm519_vm10 = vmand %vm503_vm7, %vm479_vm4 }
 0x1d2   :  { %vm516_vm15 = vmand %vm500_vm0, %vm479_vm4 }
 0x1d3   :  { %659 = vmin.xlane.f32.xlu0 %v642_v22  ;;  %vm502_vm12 = vmxor %vm464_vm5, %vm1341_vm2  ;;  %v648_v22 = vsel %vm519_vm10, %v1836_v21, 1e+30  ;;  %v645_v26 = vsel %vm516_vm15, %v1782_v16, 1e+30  ;;  %v538_v21 = vld [vmem:[#allocation2 + $0x50] sm:$0xff] }
 0x1d4   :  { %vm521_vm14 = vmand %vm505_vm11, %vm479_vm4  ;;  %vm2074_vm11 = vcmp.eq.s32.totalorder %v1743_v1, %v1548_v0  ;;  %v530_v1 = vld [vmem:[#allocation2 + $0x10] sm:$0xff] }
 0x1d5   :  { %586 = vmax.xlane.f32.xlu1 %v557_v43  ;;  %vm518_vm6 = vmand %vm502_vm12, %vm479_vm4  ;;  %v650_v31 = vsel %vm521_vm14, %v382_v45, 1e+30  ;;  %vm2075_vm14 = vcmp.eq.s32.totalorder %v1854_v25, %v1548_v0  ;;  %v628_v43 = vld [vmem:[#allocation3 + $0x18] sm:$0xff] }
 0x1d6   :  { %vm504_vm5 = vmxor %vm466_vm9, %vm1341_vm2  ;;  %vm2073_vm9 = vcmp.eq.s32.totalorder %v1828_v46, %v1548_v0 }
 0x1d7   :  { %663 = vmin.xlane.f32.xlu0 %v644_v33  ;;  %vm523_vm10 = vmand %vm507_vm3, %vm479_vm4  ;;  %v647_v33 = vsel %vm518_vm6, %v1797_v42, 1e+30  ;;  %v534_v42 = vld [vmem:[#allocation2 + $0x30] sm:$0xff] }
 0x1d8   :  { %vm520_vm7 = vmand %vm504_vm5, %vm479_vm4  ;;  %v652_v35 = vsel %vm523_vm10, %v384_v56, 1e+30  ;;  %vm2076_vm10 = vcmp.eq.s32.totalorder %v1878_v11, %v1548_v0  ;;  %v539_v11 = vld [vmem:[#allocation2 + $0x58] sm:$0xff] }
 0x1d9   :  { %590 = vmax.xlane.f32.xlu1 %v559_v12  ;;  %vm506_vm8 = vmxor %vm2073_vm9, %vm1341_vm2  ;;  %v649_v37 = vsel %vm520_vm7, %v1817_v51, 1e+30  ;;  %vm2077_vm7 = vcmask 7168   ;;  %v536_v51 = vld [vmem:[#allocation2 + $0x40] sm:$0xff] }
 0x1da   :  { %vm525_vm0 = vmand %vm509_vm1, %vm479_vm4 }
 0x1db   :  { %667 = vmin.xlane.f32.xlu0 %v646_v40  ;;  %vm511_vm15 = vmxor %vm2074_vm11, %vm1341_vm2  ;;  %v654_v40 = vsel %vm525_vm0, %v386_v38, 1e+30 }
 0x1dc   :  { %vm522_vm12 = vmand %vm506_vm8, %vm479_vm4 }
 0x1dd   :  { %661 = vmin.xlane.f32.xlu1 %v643_v13  ;;  %vm508_vm3 = vmxor %vm2075_vm14, %vm1341_vm2  ;;  %v651_v54 = vsel %vm522_vm12, %v1842_v60, 1e+30  ;;  %v535_v60 = vld [vmem:[#allocation2 + $0x38] sm:$0xff] }
 0x1de   :  { %vm527_vm6 = vmand %vm511_vm15, %vm479_vm4 }
 0x1df   :  { %671 = vmin.xlane.f32.xlu0 %v648_v22  ;;  %vm524_vm5 = vmand %vm508_vm3, %vm479_vm4  ;;  %v656_v55 = vsel %vm527_vm6, %v388_v2, 1e+30  ;;  %v543_v2 = vld [vmem:[#allocation2 + $0x78] sm:$0xff] }
 0x1e0   :  { %vm510_vm13 = vmxor %vm2076_vm10, %vm1341_vm2  ;;  %v653_v57 = vsel %vm524_vm5, %v1867_v8, 1e+30 }
 0x1e1   :  { %665 = vmin.xlane.f32.xlu1 %v645_v26  ;;  %vm526_vm1 = vmand %vm510_vm13, %vm479_vm4 }
 0x1e2   :  { %v655_v63 = vsel %vm526_vm1, %v1890_v17, 1e+30  ;;  %vm2078_vm2 = vmmov %vm2077_vm7  ;;  %v626_v17 = vld [vmem:[#allocation3 + $0x8] sm:$0xff] }
 0x1e3   :  { %675 = vmin.xlane.f32.xlu0 %v650_v31  ;;  %vm2079_vm4 = vmmov %vm2078_vm2  ;;  %v630_v31 = vld [vmem:[#allocation3 + $0x28] sm:$0xff] }
 0x1e4   :  { %vm2080_vm9 = vmmov %vm2078_vm2 }
 0x1e5   :  { %669 = vmin.xlane.f32.xlu1 %v647_v33  ;;  %vm2081_vm8 = vmmov %vm2078_vm2  ;;  %v627_v33 = vld [vmem:[#allocation3 + $0x10] sm:$0xff] }
 0x1e6   :  { %vm2082_vm0 = vmmov %vm2078_vm2 }
 0x1e7   :  { %679 = vmin.xlane.f32.xlu0 %v652_v35  ;;  %vm2083_vm11 = vmmov %vm2082_vm0 }
 0x1e8   :  { %vm2084_vm15 = vmmov %vm2082_vm0 }
 0x1e9   :  { %673 = vmin.xlane.f32.xlu1 %v649_v37  ;;  %vm2085_vm12 = vmmov %vm2082_vm0 }
 0x1ea   :  { %vm2086_vm14 = vmmov %vm2082_vm0 }
 0x1eb   :  { %683 = vmin.xlane.f32.xlu0 %v654_v40  ;;  %vm2087_vm3 = vmmov %vm2082_vm0 }
 0x1ec   :  { %vm2088_vm6 = vmmov %vm2082_vm0 }
 0x1ed   :  { %677 = vmin.xlane.f32.xlu1 %v651_v54  ;;  %vm2089_vm5 = vmmov %vm2082_vm0 }
 0x1ee   :  { %vm2090_vm10 = vmmov %vm2082_vm0 }
 0x1ef   :  { %687 = vmin.xlane.f32.xlu0 %v656_v55  ;;  %vm2091_vm13 = vmmov %vm2082_vm0  ;;  %v632_v55 = vld [vmem:[#allocation3 + $0x38] sm:$0xff] }
 0x1f0   :  { %vm2092_vm1 = vmmov %vm2082_vm0 }
 0x1f1   :  { %681 = vmin.xlane.f32.xlu1 %v653_v57  ;;  %v629_v57 = vld [vmem:[#allocation3 + $0x20] sm:$0xff] }
 0x1f5   :  { %685 = vmin.xlane.f32.xlu1 %v655_v63 }
 0x240   :  { %v565_v41 = vpop.xlane.xlu0 %564 }
 0x241   :  { %v594_v49 = vmax.f32 %v530_v1, %v565_v41 }
 0x243   :  { %611 = vst.msk [vmem:[#allocation2 + $0x10] sm:$0xff] %vm2077_vm7, %v594_v49  ;;  %vm2093_vm7 = vmmov %vm2082_vm0 }
 0x244   :  { %v569_v10 = vpop.xlane.xlu0 %568 }
 0x245   :  { %v596_v0 = vmax.f32 %v532_v53, %v569_v10  ;;  %v634_v53 = vld [vmem:[#allocation3 + $0x48] sm:$0xff]  ;;  %v631_v10 = vld [vmem:[#allocation3 + $0x30] sm:$0xff] }
 0x246   :  { %v1159_v16 = vpop.xlane.xlu1 %1158 }
 0x247   :  { %v1160_v20 = vrot.slane %v1159_v16, 4  ;;  %613 = vst.msk [vmem:[#allocation2 + $0x20] sm:$0xff] %vm2078_vm2, %v596_v0  ;;  %vm2094_vm2 = vmmov %vm2082_vm0 }
 0x248   :  { %v573_v3 = vpop.xlane.xlu0 %572 }
 0x249   :  { %v1161_v44 = vadd.f32 %v1160_v20, %v1159_v16  ;;  %v598_v47 = vmax.f32 %v534_v42, %v573_v3 }
 0x24a   :  { %v567_v48 = vpop.xlane.xlu1 %566 }
 0x24b   :  { %v1162_v30 = vrot.slane %v1161_v44, 2  ;;  %v595_v50 = vmax.f32 %v531_v58, %v567_v48  ;;  %615 = vst.msk [vmem:[#allocation2 + $0x30] sm:$0xff] %vm2079_vm4, %v598_v47  ;;  %vm2095_vm4 = vmmov %vm2082_vm0  ;;  %v636_v58 = vld [vmem:[#allocation3 + $0x58] sm:$0xff] }
 0x24c   :  { %v577_v18 = vpop.xlane.xlu0 %576 }
 0x24d   :  { %612 = vst.msk [vmem:[#allocation2 + $0x18] sm:$0xff] %vm2080_vm9, %v595_v50  ;;  %v1163_v46 = vadd.f32 %v1162_v30, %v1161_v44  ;;  %v600_v27 = vmax.f32 %v536_v51, %v577_v18  ;;  %vm2096_vm9 = vmmov %vm2082_vm0  ;;  %v633_v44 = vld [vmem:[#allocation3 + $0x40] sm:$0xff]  ;;  %v638_v50 = vld [vmem:[#allocation3 + $0x68] sm:$0xff] }
 0x24e   :  { %v571_v32 = vpop.xlane.xlu1 %570  ;;  %v635_v51 = vld [vmem:[#allocation3 + $0x50] sm:$0xff] }
 0x24f   :  { %v597_v52 = vmax.f32 %v533_v59, %v571_v32  ;;  %v1164_v4 = vrot.slane %v1163_v46, 1  ;;  %617 = vst.msk [vmem:[#allocation2 + $0x40] sm:$0xff] %vm2081_vm8, %v600_v27  ;;  %vm2097_vm8 = vmmov %vm2082_vm0  ;;  %v640_v32 = vld [vmem:[#allocation3 + $0x78] sm:$0xff] }
 0x250   :  { %v581_v5 = vpop.xlane.xlu0 %580 }
 0x251   :  { %614 = vst.msk [vmem:[#allocation2 + $0x28] sm:$0xff] %vm2082_vm0, %v597_v52  ;;  %v1165_v23 = vadd.f32 %v1164_v4, %v1163_v46  ;;  %v602_v36 = vmax.f32 %v538_v21, %v581_v5  ;;  %v637_v52 = vld [vmem:[#allocation3 + $0x60] sm:$0xff] }
 0x252   :  { %v575_v25 = vpop.xlane.xlu1 %574 }
 0x253   :  { %v599_v39 = vmax.f32 %v535_v60, %v575_v25  ;;  %1305 = vpush %v1165_v23  ;;  %v639_v23 = vld [vmem:[#allocation3 + $0x70] sm:$0xff] }
 0x254   :  { %619 = vst.msk [vmem:[#allocation2 + $0x50] sm:$0xff] %vm2083_vm11, %v602_v36  ;;  %v585_v45 = vpop.xlane.xlu0 %584  ;;  %vm2098_vm11 = vmmov %vm2082_vm0 }
 0x255   :  { %616 = vst.msk [vmem:[#allocation2 + $0x38] sm:$0xff] %vm2084_vm15, %v599_v39  ;;  %v604_v7 = vmax.f32 %v540_v6, %v585_v45  ;;  %vm2099_vm15 = vmmov %vm2082_vm0 }
 0x256   :  { %v579_v8 = vpop.xlane.xlu1 %578 }
 0x257   :  { %v601_v24 = vmax.f32 %v537_v61, %v579_v8  ;;  %621 = vst.msk [vmem:[#allocation2 + $0x60] sm:$0xff] %vm2085_vm12, %v604_v7  ;;  %vm2100_vm12 = vmmov %vm2082_vm0 }
 0x258   :  { %v589_v14 = vpop.xlane.xlu0 %588 }
 0x259   :  { %618 = vst.msk [vmem:[#allocation2 + $0x48] sm:$0xff] %vm2086_vm14, %v601_v24  ;;  %v606_v15 = vmax.f32 %v542_v9, %v589_v14  ;;  %vm2101_vm14 = vmmov %vm2082_vm0 }
 0x25a   :  { %v583_v62 = vpop.xlane.xlu1 %582 }
 0x25b   :  { %v603_v56 = vmax.f32 %v539_v11, %v583_v62  ;;  %623 = vst.msk [vmem:[#allocation2 + $0x70] sm:$0xff] %vm2087_vm3, %v606_v15  ;;  %vm2102_vm3 = vmmov %vm2082_vm0 }
 0x25c   :  { %v660_v19 = vpop.xlane.xlu0 %659 }
 0x25d   :  { %620 = vst.msk [vmem:[#allocation2 + $0x58] sm:$0xff] %vm2088_vm6, %v603_v56  ;;  %v690_v29 = vmin.f32 %v626_v17, %v660_v19  ;;  %vm2103_vm6 = vmmov %vm2082_vm0 }
 0x25e   :  { %v587_v34 = vpop.xlane.xlu1 %586 }
 0x25f   :  { %v605_v38 = vmax.f32 %v541_v28, %v587_v34  ;;  %706 = vst.msk [vmem:[#allocation3 + $0x8] sm:$0xff] %vm2089_vm5, %v690_v29  ;;  %vm2104_vm5 = vmmov %vm2082_vm0 }
 0x260   :  { %v664_v12 = vpop.xlane.xlu0 %663 }
 0x261   :  { %622 = vst.msk [vmem:[#allocation2 + $0x68] sm:$0xff] %vm2090_vm10, %v605_v38  ;;  %v692_v13 = vmin.f32 %v628_v43, %v664_v12 }
 0x262   :  { %v591_v22 = vpop.xlane.xlu1 %590 }
 0x263   :  { %v607_v26 = vmax.f32 %v543_v2, %v591_v22  ;;  %708 = vst.msk [vmem:[#allocation3 + $0x18] sm:$0xff] %vm2091_vm13, %v692_v13 }
 0x264   :  { %v668_v35 = vpop.xlane.xlu0 %667 }
 0x265   :  { %624 = vst.msk [vmem:[#allocation2 + $0x78] sm:$0xff] %vm2092_vm1, %v607_v26  ;;  %v694_v37 = vmin.f32 %v630_v31, %v668_v35 }
 0x266   :  { %v662_v40 = vpop.xlane.xlu1 %661 }
 0x267   :  { %v691_v54 = vmin.f32 %v627_v33, %v662_v40  ;;  %710 = vst.msk [vmem:[#allocation3 + $0x28] sm:$0xff] %vm2093_vm7, %v694_v37 }
 0x268   :  { %v672_v63 = vpop.xlane.xlu0 %671 }
 0x269   :  { %707 = vst.msk [vmem:[#allocation3 + $0x10] sm:$0xff] %vm2094_vm2, %v691_v54  ;;  %v696_v1 = vmin.f32 %v632_v55, %v672_v63 }
 0x26a   :  { %v666_v41 = vpop.xlane.xlu1 %665 }
 0x26b   :  { %v693_v49 = vmin.f32 %v629_v57, %v666_v41  ;;  %712 = vst.msk [vmem:[#allocation3 + $0x38] sm:$0xff] %vm2095_vm4, %v696_v1 }
 0x26c   :  { %v676_v0 = vpop.xlane.xlu0 %675 }
 0x26d   :  { %709 = vst.msk [vmem:[#allocation3 + $0x20] sm:$0xff] %vm2096_vm9, %v693_v49  ;;  %v698_v16 = vmin.f32 %v634_v53, %v676_v0 }
 0x26e   :  { %v670_v20 = vpop.xlane.xlu1 %669 }
 0x26f   :  { %v695_v42 = vmin.f32 %v631_v10, %v670_v20  ;;  %714 = vst.msk [vmem:[#allocation3 + $0x48] sm:$0xff] %vm2097_vm8, %v698_v16 }
 0x270   :  { %v680_v3 = vpop.xlane.xlu0 %679 }
 0x271   :  { %711 = vst.msk [vmem:[#allocation3 + $0x30] sm:$0xff] %vm2082_vm0, %v695_v42  ;;  %v700_v47 = vmin.f32 %v636_v58, %v680_v3 }
 0x272   :  { %v674_v48 = vpop.xlane.xlu1 %673 }
 0x273   :  { %v697_v30 = vmin.f32 %v633_v44, %v674_v48  ;;  %716 = vst.msk [vmem:[#allocation3 + $0x58] sm:$0xff] %vm2098_vm11, %v700_v47 }
 0x274   :  { %v684_v59 = vpop.xlane.xlu0 %683 }
 0x275   :  { %713 = vst.msk [vmem:[#allocation3 + $0x40] sm:$0xff] %vm2099_vm15, %v697_v30  ;;  %v702_v18 = vmin.f32 %v638_v50, %v684_v59 }
 0x276   :  { %v678_v46 = vpop.xlane.xlu1 %677 }
 0x277   :  { %v699_v27 = vmin.f32 %v635_v51, %v678_v46  ;;  %718 = vst.msk [vmem:[#allocation3 + $0x68] sm:$0xff] %vm2100_vm12, %v702_v18 }
 0x278   :  { %v688_v21 = vpop.xlane.xlu0 %687 }
 0x279   :  { %715 = vst.msk [vmem:[#allocation3 + $0x50] sm:$0xff] %vm2101_vm14, %v699_v27  ;;  %v704_v4 = vmin.f32 %v640_v32, %v688_v21 }
 0x27a   :  { %v682_v60 = vpop.xlane.xlu1 %681 }
 0x27b   :  { %v701_v5 = vmin.f32 %v637_v52, %v682_v60  ;;  %720 = vst.msk [vmem:[#allocation3 + $0x78] sm:$0xff] %vm2102_vm3, %v704_v4 }
 0x27d   :  { %717 = vst.msk [vmem:[#allocation3 + $0x60] sm:$0xff] %vm2103_vm6, %v701_v5 }
 0x27e   :  { %v686_v36 = vpop.xlane.xlu1 %685 }
 0x27f   :  { %v703_v25 = vmin.f32 %v639_v23, %v686_v36 }
 0x281   :  { %719 = vst.msk [vmem:[#allocation3 + $0x70] sm:$0xff] %vm2104_vm5, %v703_v25 }
 0x284   :  { %s1306_s26 = spop %1305 }
 0x285   :  { %v1167_v39 = vstv %s1306_s26 }
 0x286   :  { %1168 = vst [vmem:[#allocation4] sm:$0xff] %v1167_v39 }
 0x287   :  { %1329 = shalt.err (!%p1326_p4)
}
 0x288   :  { %1178 = dma.vmem_to_hbm [thread:$0]  %s1176_s25, 128, %s2049_s6, [#allocation5]  }
 0x289   :  { %1338 = dma.done.wait [#allocation5], 128  }
 0x28a   :  { %1339 = vsyncadd [#allocation5], 4294967168 }
 0x28b   :  { %1182 = vsyncpa [#allocation5], 1 }

</bundles_post_ra>
